<compile_context>
chip_gen: v7x
topology: tpu7x:2x2x1
jax: 0.10.0
libtpu: 0.0.40
codegen_flags: <defaults>
</compile_context>

<pallas_src>
import functools

import jax
import jax.numpy as jnp
from jax.experimental import pallas as pl
from jax.experimental.pallas import tpu as pltpu


def _scor_kernel(wb_ref, sel_ref, u_ref, i_ref, out_ref):
    # wb_ref : (2,)     SMEM  -> [weight, bias] of nn.Linear(1, 1)
    # sel_ref: (128, G) VMEM  -> 0/1 block-diagonal selector (constant block)
    # u_ref, i_ref: (TR, 128) VMEM lane-dense tiles (G batch rows per vector row)
    # out_ref: (TR, G)  VMEM tile of ratings (row-major == batch order)
    d = u_ref[...] - i_ref[...]
    sq = d * d
    # Grouped (per original batch row) sum of squares on the MXU.  HIGHEST
    # precision keeps the f32 reduction at ~f32 accuracy.
    ssum = jnp.dot(sq, sel_ref[...],
                   preferred_element_type=jnp.float32,
                   precision=jax.lax.Precision.HIGHEST)          # (TR, G)
    p2 = jnp.sqrt(ssum)
    # nn.Linear(1, 1): rating = p2 * w + b
    out_ref[...] = p2 * wb_ref[0] + wb_ref[1]


def _round_up(x, m):
    return ((x + m - 1) // m) * m


def _pick_tile_rows(n_rows, requested):
    """Rows of the lane-dense (B/G, 128) view per grid tile."""
    if requested is None:
        tr = pl.cdiv(n_rows, 2)      # aim for >= 2 tiles (v7x dual-TensorCore)
    else:
        tr = max(1, requested)
    tr = min(tr, 2048)               # ~1 MiB per pipeline buffer (f32, 128 lanes)
    if tr >= n_rows:
        return n_rows                # single full-extent block (always legal)
    tr = _round_up(tr, 8)            # sublane-aligned; ragged tail is masked
    return n_rows if tr >= n_rows else tr


def scor_plus_forward(user, item, user_emb, item_emb, lin_w, lin_b,
                      block_rows=None):
    """Returns (rating, u_src, i_src) matching the PyTorch forward."""
    F = user_emb.shape[1]
    if 128 % F != 0:
        # TODO(synk): support n_factors that do not divide 128 (fall back to an
        # un-packed (TB, F) tile + cross-lane reduction).
        raise NotImplementedError("scor_plus_forward requires 128 % n_factors == 0")
    G = 128 // F                     # batch rows packed per 128-lane vector row

    B = user.shape[0]
    B_pad = _round_up(B, G)
    if B_pad != B:
        # Pad only the tiny (B,) index vectors; never the (B, F) gathers.
        user = jnp.pad(user, (0, B_pad - B))
        item = jnp.pad(item, (0, B_pad - B))

    # Embedding gather in plain JAX/XLA (see header).
    u_gath = user_emb[user].astype(jnp.float32)                  # (B_pad, F)
    i_gath = item_emb[item].astype(jnp.float32)
    u_src = u_gath if B_pad == B else u_gath[:B]
    i_src = i_gath if B_pad == B else i_gath[:B]

    # Free, contiguous row-major reshape to the lane-dense view.
    R = B_pad // G
    u_in = u_gath.reshape(R, 128)
    i_in = i_gath.reshape(R, 128)

    tr = _pick_tile_rows(R, None if block_rows is None else max(1, block_rows // G))
    num_tiles = pl.cdiv(R, tr)       # ragged last tile handled by Pallas masking

    # Linear(1, 1) parameters packed into a single SMEM scalar operand.
    wb = jnp.stack([jnp.asarray(lin_w, jnp.float32).reshape(()),
                    jnp.asarray(lin_b, jnp.float32).reshape(())])        # (2,)

    # 0/1 block-diagonal selector: column g sums lanes [g*F, (g+1)*F).
    sel = (jnp.arange(128, dtype=jnp.int32)[:, None] // F
           == jnp.arange(G, dtype=jnp.int32)[None, :]).astype(jnp.float32)

    rating_2d = pl.pallas_call(
        _scor_kernel,
        out_shape=jax.ShapeDtypeStruct((R, G), jnp.float32),
        grid_spec=pltpu.PrefetchScalarGridSpec(
            num_scalar_prefetch=0,
            grid=(num_tiles,),
            in_specs=[
                pl.BlockSpec(memory_space=pltpu.MemorySpace.SMEM),  # [w, b]
                pl.BlockSpec((128, G), lambda i: (0, 0)),           # selector
                pl.BlockSpec((tr, 128), lambda i: (i, 0)),          # u tiles
                pl.BlockSpec((tr, 128), lambda i: (i, 0)),          # i tiles
            ],
            out_specs=pl.BlockSpec((tr, G), lambda i: (i, 0)),
        ),
        compiler_params=pltpu.CompilerParams(
            dimension_semantics=("parallel",)),   # data-parallel batch tiles
    )(wb, sel, u_in, i_in)

    rating = rating_2d.reshape(B_pad)[:B]         # row-major flatten == batch order
    return rating, u_src, i_src


def _reference(user, item, user_emb, item_emb, lin_w, lin_b):
    u = user_emb[user]
    i = item_emb[item]
    p2 = jnp.linalg.norm(u - i, axis=1)
    return p2 * lin_w + lin_b, u, i


def _check(rating, u_src, i_src, user, item, user_emb, item_emb, lin_w, lin_b):
    rating_ref, u_ref, i_ref = _reference(user, item, user_emb, item_emb,
                                          lin_w, lin_b)
    assert rating.shape == (user.shape[0],)
    assert u_src.shape == u_ref.shape and i_src.shape == i_ref.shape
    # Tolerance leaves headroom for MXU pass-count differences across TPU
    # generations; structural bugs would show errors >> 1e-3.
    assert jnp.allclose(rating, rating_ref, atol=1e-3, rtol=1e-3)
    assert jnp.allclose(u_src, u_ref) and jnp.allclose(i_src, i_ref)


if __name__ == "__main__":
    # Deterministic synthetic parameters (module __init__ uses 0.1 * rand).
    n_users, n_items, n_factors = 16, 24, 32

    key = jax.random.PRNGKey(0)
    (k_u, k_i, k_w, k_b,
     k_u1, k_i1, k_u2, k_i2, k_u3, k_i3) = jax.random.split(key, 10)

    initrange = 0.1
    user_emb = initrange * jax.random.uniform(k_u, (n_users, n_factors),
                                              dtype=jnp.float32)
    item_emb = initrange * jax.random.uniform(k_i, (n_items, n_factors),
                                              dtype=jnp.float32)
    lin_w = jax.random.uniform(k_w, (), dtype=jnp.float32) - 0.5  # Linear(1,1).weight
    lin_b = jax.random.uniform(k_b, (), dtype=jnp.float32) - 0.5  # Linear(1,1).bias

    # --- small single-tile case ------------------------------------------------
    batch = 8
    user1 = jax.random.randint(k_u1, (batch,), 0, n_users)
    item1 = jax.random.randint(k_i1, (batch,), 0, n_items)
    fwd = jax.jit(functools.partial(scor_plus_forward,
                                    user_emb=user_emb, item_emb=item_emb,
                                    lin_w=lin_w, lin_b=lin_b))
    out1 = fwd(user1, item1)
    jax.block_until_ready(out1)
    _check(*out1, user1, item1, user_emb, item_emb, lin_w, lin_b)

    # --- multi-tile + ragged-tail case (exercises cdiv grid / masked tail) -----
    batch2 = 300
    user2 = jax.random.randint(k_u2, (batch2,), 0, n_users)
    item2 = jax.random.randint(k_i2, (batch2,), 0, n_items)
    fwd2 = jax.jit(functools.partial(scor_plus_forward,
                                     user_emb=user_emb, item_emb=item_emb,
                                     lin_w=lin_w, lin_b=lin_b,
                                     block_rows=128))   # grid=(3,), ragged tail
    out2 = fwd2(user2, item2)
    jax.block_until_ready(out2)
    _check(*out2, user2, item2, user_emb, item_emb, lin_w, lin_b)

    # --- batch not a multiple of the packing factor (index-pad path) -----------
    batch3 = 5
    user3 = jax.random.randint(k_u3, (batch3,), 0, n_users)
    item3 = jax.random.randint(k_i3, (batch3,), 0, n_items)
    out3 = fwd(user3, item3)
    jax.block_until_ready(out3)
    _check(*out3, user3, item3, user_emb, item_emb, lin_w, lin_b)

    print("KERNEL_OK")
</pallas_src>

<mosaic_0001>
module attributes {stable_mosaic.version = 11 : i64} {
  func.func @_scor_kernel(%arg0: i32, %arg1: memref<2xf32, #tpu.memory_space<smem>>, %arg2: memref<128x4xf32, #tpu.memory_space<vmem>>, %arg3: memref<2x128xf32, #tpu.memory_space<vmem>>, %arg4: memref<2x128xf32, #tpu.memory_space<vmem>>, %arg5: memref<2x4xf32, #tpu.memory_space<vmem>>) attributes {dimension_semantics = [#tpu.dimension_semantics<parallel>], iteration_bounds = array<i64: 1>, scalar_prefetch = 0 : i64, scratch_operands = 0 : i64, tpu.core_type = #tpu.core_type<tc>, window_params = [{transform_indices = @transform_0, window_bounds = array<i64: 2>}, {pipeline_mode = #tpu.pipeline_mode<synchronous>, transform_indices = @transform_1, window_bounds = array<i64: 128, 4>}, {transform_indices = @transform_2, window_bounds = array<i64: 2, 128>}, {transform_indices = @transform_3, window_bounds = array<i64: 2, 128>}, {transform_indices = @transform_4, window_bounds = array<i64: 2, 4>}]} {
    %c0 = arith.constant 0 : index
    %c0_0 = arith.constant 0 : index
    %0 = vector.load %arg3[%c0, %c0_0] : memref<2x128xf32, #tpu.memory_space<vmem>>, vector<2x128xf32>
    %c0_1 = arith.constant 0 : index
    %c0_2 = arith.constant 0 : index
    %1 = vector.load %arg4[%c0_1, %c0_2] : memref<2x128xf32, #tpu.memory_space<vmem>>, vector<2x128xf32>
    %2 = arith.subf %0, %1 : vector<2x128xf32>
    %3 = arith.mulf %2, %2 : vector<2x128xf32>
    %c0_3 = arith.constant 0 : index
    %c0_4 = arith.constant 0 : index
    %4 = vector.load %arg2[%c0_3, %c0_4] : memref<128x4xf32, #tpu.memory_space<vmem>>, vector<128x4xf32>
    %cst = arith.constant dense<0.000000e+00> : vector<2x4xf32>
    %5 = tpu.matmul %3, %4, %cst {dimension_numbers = #tpu.dot_dimension_numbers<[1], [0], [0], [1], [0, 0, 1, 1], [], []>, precision = #tpu.contract_precision<fp32>} : vector<2x128xf32>, vector<128x4xf32>, vector<2x4xf32> -> vector<2x4xf32>
    %6 = math.sqrt %5 : vector<2x4xf32>
    %c0_5 = arith.constant 0 : index
    %7 = memref.load %arg1[%c0_5] : memref<2xf32, #tpu.memory_space<smem>>
    %8 = vector.broadcast %7 : f32 to vector<2x4xf32>
    %9 = arith.mulf %6, %8 : vector<2x4xf32>
    %c1 = arith.constant 1 : index
    %10 = memref.load %arg1[%c1] : memref<2xf32, #tpu.memory_space<smem>>
    %11 = vector.broadcast %10 : f32 to vector<2x4xf32>
    %12 = arith.addf %9, %11 : vector<2x4xf32>
    %c0_6 = arith.constant 0 : index
    %c0_7 = arith.constant 0 : index
    %13 = vector.load %arg5[%c0_6, %c0_7] : memref<2x4xf32, #tpu.memory_space<vmem>>, vector<2x4xf32>
    tpu.vector_store %arg5[%c0_6, %c0_7], %12 {strides = array<i32>} : memref<2x4xf32, #tpu.memory_space<vmem>>, vector<2x4xf32>,
    return
  }
  func.func @transform_0(%arg0: i32) -> i32 {
    %c0_i32 = arith.constant 0 : i32
    %c0_i32_0 = arith.constant 0 : i32
    return %c0_i32 : i32
  }
  func.func @transform_1(%arg0: i32) -> (i32, i32) {
    %c0_i32 = arith.constant 0 : i32
    %c0_i32_0 = arith.constant 0 : i32
    %c0_i32_1 = arith.constant 0 : i32
    return %c0_i32, %c0_i32_0 : i32, i32
  }
  func.func @transform_2(%arg0: i32) -> (i32, i32) {
    %c0_i32 = arith.constant 0 : i32
    %c0_i32_0 = arith.constant 0 : i32
    return %arg0, %c0_i32 : i32, i32
  }
  func.func @transform_3(%arg0: i32) -> (i32, i32) {
    %c0_i32 = arith.constant 0 : i32
    %c0_i32_0 = arith.constant 0 : i32
    return %arg0, %c0_i32 : i32, i32
  }
  func.func @transform_4(%arg0: i32) -> (i32, i32) {
    %c0_i32 = arith.constant 0 : i32
    %c0_i32_0 = arith.constant 0 : i32
    return %arg0, %c0_i32 : i32, i32
  }
}

</mosaic_0001>

<bundles_post_ra>
// kernel: scor_plus_forward.1
= control target key start
LH: loop header
LB: loop body
LE: loop exit
PB: predicated region body
PF: predicated region fallthrough
CT: control target
= control target key end

     0   :  { %9 = vsyncpa [#allocation3], 0  ;;  %s1549_s0 = inlined_call_operand.vmem [shape: f32[2], index: 0, kind: input, shape index: {}]   ;;  %s1550_s1 = inlined_call_operand.vmem [shape: f32[128,4], index: 1, kind: input, shape index: {}]   ;;  %s1551_s2 = inlined_call_operand.vmem [shape: f32[2,128], index: 2, kind: input, shape index: {}]   ;;  %s1552_s3 = inlined_call_operand.vmem [shape: f32[2,128], index: 3, kind: input, shape index: {}]   ;;  %s1553_s4 = inlined_call_operand.vmem [shape: f32[2,4], index: 4, kind: output, shape index: {}]  }
   0x1   :  { %s16_s17 = sshll.u32 %s1549_s0, 4  ;;  %s17_s17 = int_to_ptr.vmem [resolvable:$true] %s16_s17 }
   0x2   :  { %s1183_s18 = scalar_lea.vmem %s17_s17, 16  ;;  %p1188_p1 = scmp.lt.s32.totalorder %s17_s17, %s17_s17 }
   0x3   :  { %p1184_p0 = scmp.ne.s32.totalorder %s17_s17, %s1183_s18  ;;  %p1189_p2 = scmp.lt.s32.totalorder %s1183_s18, %s1183_s18 }
   0x5   :  { %p1190_p3 = por %p1189_p2, %p1188_p1 }
   0x7   :  { %p1191_p4 = pnand %p1190_p3, %p1184_p0 }
   0x9   :  { %1194 = shalt.err (!%p1191_p4)
}
   0xa   :  { %s1197_s19 = smov [#allocation2]  }
   0xb   :  { %19 = dma.vmem_to_smem %s17_s17, 16, %s1197_s19, [#allocation3]  }
   0xc   :  { %1195 = dma.done.wait [#allocation3], 16  }
   0xd   :  { %1196 = vsyncadd [#allocation3], 4294967280 }
   0xe   :  { %29 = sfence }
   0xf   :  { %v34_v0 = vld [vmem:[%s1550_s1] sm:$0xff]  ;;  %v35_v1 = vld [vmem:[%s1550_s1 + $0x8] sm:$0xff]  ;;  %v36_v2 = vld [vmem:[%s1550_s1 + $0x10] sm:$0xff]  ;;  %v1198_v3 = vmov 0.0|0.0   ;;  %vm1199_vm0 = vmmov 0   ;;  %v1200_v11 = vmov 0.0  }
  0x10   :  { %1024 = vmatprep.subr.bf16.mxu1 %v1198_v3  ;;  %1096 = vmatprep.subr.bf16.mxu0 %v1198_v3  ;;  %v51_v4 = vand.u32 4294901760, %v34_v0  ;;  %v54_v5 = vand.u32 4294901760, %v35_v1  ;;  %v37_v6 = vld [vmem:[%s1550_s1 + $0x18] sm:$0xff]  ;;  %v57_v7 = vand.u32 4294901760, %v36_v2  ;;  %v1246_v9 = vld [vmem:[%s1550_s1 + $0x20] sm:$0xff]  ;;  %v1251_v10 = vld [vmem:[%s1550_s1 + $0x28] sm:$0xff] }
  0x11   :  { %v60_v8 = vand.u32 4294901760, %v37_v6  ;;  %846 = vmatprep.mubr.msk.f32.mxu1 %vm1199_vm0, %v1200_v11  ;;  %951 = vmatprep.mubr.msk.f32.mxu0 %vm1199_vm0, %v1200_v11  ;;  %v63_v14 = vand.u32 4294901760, %v1246_v9  ;;  %v66_v15 = vand.u32 4294901760, %v1251_v10  ;;  %v1270_v16 = vld [vmem:[%s1550_s1 + $0x30] sm:$0xff]  ;;  %v1275_v17 = vld [vmem:[%s1550_s1 + $0x38] sm:$0xff]  ;;  %v1294_v23 = vld [vmem:[%s1550_s1 + $0x40] sm:$0xff] }
  0x12   :  { %v1257_v12 = vpack.c.bf16 %v54_v5, %v51_v4  ;;  %v30_v18 = vld [vmem:[%s1551_s2] sm:$0x3]  ;;  %v69_v21 = vand.u32 4294901760, %v1270_v16  ;;  %v72_v22 = vand.u32 4294901760, %v1275_v17  ;;  %v1299_v24 = vld [vmem:[%s1550_s1 + $0x48] sm:$0xff]  ;;  %v75_v28 = vand.u32 4294901760, %v1294_v23 }
  0x13   :  { %v1261_v13 = vpack.c.bf16 %v60_v8, %v57_v7  ;;  %v31_v19 = vld [vmem:[%s1552_s3] sm:$0x3]  ;;  %v1285_v20 = vpack.c.bf16 %v66_v15, %v63_v14  ;;  %v78_v29 = vand.u32 4294901760, %v1299_v24  ;;  %v1312_v30 = vld [vmem:[%s1550_s1 + $0x50] sm:$0xff]  ;;  %v1317_v31 = vld [vmem:[%s1550_s1 + $0x58] sm:$0xff]  ;;  %v1319_v32 = vsub.f32 %v34_v0, %v51_v4  ;;  %s711_s26 = sld [smem:[#allocation2 + $0x1]] }
  0x14   :  { %1026 = vmatpush3.bf16.msra.mxu1 %v1257_v12  ;;  %1098 = vmatpush3.bf16.msra.mxu0 %v1257_v12  ;;  %v32_v25 = vsub.f32 %v30_v18, %v31_v19  ;;  %v1303_v27 = vpack.c.bf16 %v72_v22, %v69_v21  ;;  %v1323_v34 = vsub.f32 %v35_v1, %v54_v5  ;;  %v81_v36 = vand.u32 4294901760, %v1312_v30  ;;  %v1334_v38 = vld [vmem:[%s1550_s1 + $0x60] sm:$0xff]  ;;  %v1341_v39 = vld [vmem:[%s1550_s1 + $0x68] sm:$0xff]  ;;  %v1363_v46 = vld [vmem:[%s1550_s1 + $0x70] sm:$0xff] }
  0x15   :  { %1027 = vmatprep.subr.bf16.mxu1 %v1198_v3  ;;  %1099 = vmatprep.subr.bf16.mxu0 %v1198_v3  ;;  %v1327_v35 = vpack.c.bf16 %v78_v29, %v75_v28  ;;  %v84_v37 = vand.u32 4294901760, %v1317_v31  ;;  %v1343_v40 = vsub.f32 %v36_v2, %v57_v7  ;;  %v1345_v41 = vsub.f32 %v37_v6, %v60_v8  ;;  %v1368_v47 = vld [vmem:[%s1550_s1 + $0x78] sm:$0xff]  ;;  %s698_s1 = sld [smem:[#allocation2]] }
  0x16   :  { %v33_v26 = vmul.f32 %v32_v25, %v32_v25  ;;  %v87_v42 = vand.u32 4294901760, %v1334_v38  ;;  %v90_v45 = vand.u32 4294901760, %v1341_v39  ;;  %v144_v48 = vand.u32 4294901760, %v1319_v32 }
  0x17   :  { %v1357_v44 = vpack.c.bf16 %v84_v37, %v81_v36  ;;  %v151_v49 = vand.u32 4294901760, %v1323_v34  ;;  %v1375_v50 = vsub.f32 %v1246_v9, %v63_v14  ;;  %v1378_v51 = vsub.f32 %v1251_v10, %v66_v15 }
  0x18   :  { %1029 = vmatpush3.bf16.msra.mxu1 %v1261_v13  ;;  %1101 = vmatpush3.bf16.msra.mxu0 %v1261_v13  ;;  %v1321_v33 = vand.u32 4294901760, %v33_v26  ;;  %v93_v52 = vand.u32 4294901760, %v1363_v46  ;;  %v96_v53 = vand.u32 4294901760, %v1368_v47  ;;  %v158_v55 = vand.u32 4294901760, %v1343_v40 }
  0x19   :  { %1030 = vmatprep.subr.bf16.mxu1 %v1198_v3  ;;  %1102 = vmatprep.subr.bf16.mxu0 %v1198_v3  ;;  %v1390_v56 = vpack.c.bf16 %v90_v45, %v87_v42  ;;  %v145_v57 = vsub.f32 %v1319_v32, %v144_v48  ;;  %v152_v58 = vsub.f32 %v1323_v34, %v151_v49  ;;  %v165_v59 = vand.u32 4294901760, %v1345_v41 }
  0x1a   :  { %v1349_v43 = vsub.f32 %v33_v26, %v1321_v33  ;;  %v1398_v60 = vsub.f32 %v1270_v16, %v69_v21  ;;  %v1401_v61 = vsub.f32 %v1275_v17, %v72_v22  ;;  %v159_v63 = vsub.f32 %v1343_v40, %v158_v55 }
  0x1b   :  { %v172_v0 = vand.u32 4294901760, %v1375_v50  ;;  %v179_v1 = vand.u32 4294901760, %v1378_v51  ;;  %v1413_v2 = vpack.c.bf16 %v96_v53, %v93_v52  ;;  %v146_v4 = vand.u32 4294901760, %v145_v57 }
  0x1c   :  { %1032 = vmatpush3.bf16.msra.mxu1 %v1285_v20  ;;  %1104 = vmatpush3.bf16.msra.mxu0 %v1285_v20  ;;  %v133_v54 = vand.u32 4294901760, %v1349_v43  ;;  %v153_v5 = vand.u32 4294901760, %v152_v58  ;;  %v166_v6 = vsub.f32 %v1345_v41, %v165_v59  ;;  %v1419_v7 = vsub.f32 %v1294_v23, %v75_v28 }
  0x1d   :  { %1033 = vmatprep.subr.bf16.mxu1 %v1198_v3  ;;  %1105 = vmatprep.subr.bf16.mxu0 %v1198_v3  ;;  %v1422_v8 = vsub.f32 %v1299_v24, %v78_v29  ;;  %v1121_v9 = vpack.c.bf16 %v151_v49, %v144_v48  ;;  %v160_v14 = vand.u32 4294901760, %v159_v63  ;;  %v173_v15 = vsub.f32 %v1375_v50, %v172_v0 }
  0x1e   :  { %v134_v62 = vsub.f32 %v1349_v43, %v133_v54  ;;  %v180_v16 = vsub.f32 %v1378_v51, %v179_v1  ;;  %v1049_v17 = vpack.c.bf16 %v153_v5, %v146_v4  ;;  %v167_v18 = vand.u32 4294901760, %v166_v6 }
  0x1f   :  { %v186_v19 = vand.u32 4294901760, %v1398_v60  ;;  %v193_v21 = vand.u32 4294901760, %v1401_v61  ;;  %v1435_v22 = vsub.f32 %v1312_v30, %v81_v36  ;;  %v1440_v23 = vsub.f32 %v1317_v31, %v84_v37 }
  0x20   :  { %1035 = vmatpush3.bf16.msra.mxu1 %v1303_v27  ;;  %1107 = vmatpush3.bf16.msra.mxu0 %v1303_v27  ;;  %v135_v10 = vand.u32 4294901760, %v134_v62  ;;  %v1124_v24 = vpack.c.bf16 %v165_v59, %v158_v55  ;;  %v174_v25 = vand.u32 4294901760, %v173_v15  ;;  %v181_v26 = vand.u32 4294901760, %v180_v16 }
  0x21   :  { %1036 = vmatprep.subr.bf16.mxu1 %v1198_v3  ;;  %1108 = vmatprep.subr.bf16.mxu0 %v1198_v3  ;;  %v200_v28 = vand.u32 4294901760, %v1419_v7  ;;  %v1052_v29 = vpack.c.bf16 %v167_v18, %v160_v14  ;;  %v187_v48 = vsub.f32 %v1398_v60, %v186_v19  ;;  %v194_v30 = vsub.f32 %v1401_v61, %v193_v21 }
  0x22   :  { %v207_v36 = vand.u32 4294901760, %v1422_v8  ;;  %v1451_v31 = vsub.f32 %v1334_v38, %v87_v42  ;;  %v1456_v37 = vsub.f32 %v1341_v39, %v90_v45  ;;  %v1127_v49 = vpack.c.bf16 %v179_v1, %v172_v0 }
  0x23   :  { %v214_v55 = vand.u32 4294901760, %v1435_v22  ;;  %v221_v57 = vand.u32 4294901760, %v1440_v23  ;;  %v1055_v38 = vpack.c.bf16 %v181_v26, %v174_v25  ;;  %v188_v42 = vand.u32 4294901760, %v187_v48 }
  0x24   :  { %1038 = vmatpush3.bf16.msra.mxu1 %v1327_v35  ;;  %1110 = vmatpush3.bf16.msra.mxu0 %v1327_v35  ;;  %v195_v58 = vand.u32 4294901760, %v194_v30  ;;  %v208_v39 = vsub.f32 %v1422_v8, %v207_v36  ;;  %v1471_v45 = vsub.f32 %v1363_v46, %v93_v52  ;;  %v1476_v59 = vsub.f32 %v1368_v47, %v96_v53 }
  0x25   :  { %1039 = vmatprep.subr.bf16.mxu1 %v1198_v3  ;;  %1111 = vmatprep.subr.bf16.mxu0 %v1198_v3  ;;  %v1130_v62 = vpack.c.bf16 %v193_v21, %v186_v19  ;;  %v215_v0 = vsub.f32 %v1435_v22, %v214_v55  ;;  %v222_v1 = vsub.f32 %v1440_v23, %v221_v57  ;;  %v228_v6 = vand.u32 4294901760, %v1451_v31 }
  0x26   :  { %v1058_v4 = vpack.c.bf16 %v195_v58, %v188_v42  ;;  %v209_v5 = vand.u32 4294901760, %v208_v39  ;;  %v235_v46 = vand.u32 4294901760, %v1456_v37  ;;  %v1133_v47 = vpack.c.bf16 %v207_v36, %v200_v28 }
  0x27   :  { %v216_v52 = vand.u32 4294901760, %v215_v0  ;;  %v223_v53 = vand.u32 4294901760, %v222_v1  ;;  %v229_v14 = vsub.f32 %v1451_v31, %v228_v6  ;;  %v249_v16 = vand.u32 4294901760, %v1476_v59 }
  0x28   :  { %1041 = vmatpush3.bf16.msra.mxu1 %v1357_v44  ;;  %1113 = vmatpush3.bf16.msra.mxu0 %v1357_v44  ;;  %v236_v15 = vsub.f32 %v1456_v37, %v235_v46  ;;  %v1136_v18 = vpack.c.bf16 %v221_v57, %v214_v55  ;;  %vm704_vm3 = vcmask 25600  }
  0x29   :  { %1042 = vmatprep.subr.bf16.mxu1 %v1198_v3  ;;  %1114 = vmatprep.subr.bf16.mxu0 %v1198_v3  ;;  %v230_v19 = vand.u32 4294901760, %v229_v14  ;;  %v250_v25 = vsub.f32 %v1476_v59, %v249_v16 }
  0x2a   :  { %v237_v21 = vand.u32 4294901760, %v236_v15 }
  0x2b   :  { %v251_v48 = vand.u32 4294901760, %v250_v25 }
  0x2c   :  { %1044 = vmatpush3.bf16.msra.mxu1 %v1390_v56  ;;  %1116 = vmatpush3.bf16.msra.mxu0 %v1390_v56  ;;  %v1067_v26 = vpack.c.bf16 %v237_v21, %v230_v19 }
  0x2d   :  { %1045 = vmatprep.subr.bf16.mxu1 %v1198_v3  ;;  %1117 = vmatprep.subr.bf16.mxu0 %v1198_v3 }
  0x30   :  { %1047 = vmatpush3.bf16.msra.mxu1 %v1413_v2  ;;  %1119 = vmatpush3.bf16.msra.mxu0 %v1413_v2 }
  0x31   :  { %1048 = vmatprep.subr.bf16.mxu1 %v1198_v3  ;;  %1120 = vmatprep.subr.bf16.mxu0 %v1198_v3 }
  0x33   :  { %847 = vmatmul.mubr.f32.vlgmr.msra.gmra.mrb[0].mxu1 %v135_v10  ;;  %952 = vmatmul.mubr.f32.vlgmr.msra.gmra.mrb[0].mxu0 %v133_v54  ;;  %v201_v54 = vsub.f32 %v1419_v7, %v200_v28  ;;  %v1139_v28 = vpack.c.bf16 %v235_v46, %v228_v6 }
  0x34   :  { %1050 = vmatpush3.bf16.msra.mxu1 %v1049_v17  ;;  %1122 = vmatpush3.bf16.msra.mxu0 %v1121_v9  ;;  %v242_v9 = vand.u32 4294901760, %v1471_v45  ;;  %v1064_v17 = vpack.c.bf16 %v223_v53, %v216_v52 }
  0x35   :  { %1051 = vmatprep.subr.bf16.mxu1 %v1198_v3  ;;  %1123 = vmatprep.subr.bf16.mxu0 %v1198_v3  ;;  %v202_v63 = vand.u32 4294901760, %v201_v54  ;;  %v1076_v54 = vpack.c.bf16 %v1345_v41, %v1343_v40 }
  0x36   :  { %881 = vmatprep.mubr.msk.f32.mxu1 %vm1199_vm0, %v1200_v11  ;;  %986 = vmatprep.mubr.msk.f32.mxu0 %vm1199_vm0, %v1200_v11  ;;  %v1142_v36 = vpack.c.bf16 %v249_v16, %v242_v9 }
  0x37   :  { %v1061_v10 = vpack.c.bf16 %v209_v5, %v202_v63 }
  0x38   :  { %1053 = vmatpush3.bf16.msra.mxu1 %v1052_v29  ;;  %1125 = vmatpush3.bf16.msra.mxu0 %v1124_v24  ;;  %v243_v24 = vsub.f32 %v1471_v45, %v242_v9 }
  0x39   :  { %1054 = vmatprep.subr.bf16.mxu1 %v1198_v3  ;;  %1126 = vmatprep.subr.bf16.mxu0 %v1198_v3 }
  0x3a   :  { %v244_v29 = vand.u32 4294901760, %v243_v24 }
  0x3c   :  { %1056 = vmatpush3.bf16.msra.mxu1 %v1055_v38  ;;  %1128 = vmatpush3.bf16.msra.mxu0 %v1127_v49  ;;  %v1070_v30 = vpack.c.bf16 %v251_v48, %v244_v29  ;;  %v1073_v49 = vpack.c.bf16 %v1323_v34, %v1319_v32  ;;  %v1079_v32 = vpack.c.bf16 %v1378_v51, %v1375_v50 }
  0x3d   :  { %1057 = vmatprep.subr.bf16.mxu1 %v1198_v3  ;;  %1129 = vmatprep.subr.bf16.mxu0 %v1198_v3 }
  0x40   :  { %1059 = vmatpush3.bf16.msra.mxu1 %v1058_v4  ;;  %1131 = vmatpush3.bf16.msra.mxu0 %v1130_v62 }
  0x41   :  { %1060 = vmatprep.subr.bf16.mxu1 %v1198_v3  ;;  %1132 = vmatprep.subr.bf16.mxu0 %v1198_v3 }
  0x44   :  { %1062 = vmatpush3.bf16.msra.mxu1 %v1061_v10  ;;  %1134 = vmatpush3.bf16.msra.mxu0 %v1133_v47 }
  0x45   :  { %1063 = vmatprep.subr.bf16.mxu1 %v1198_v3  ;;  %1135 = vmatprep.subr.bf16.mxu0 %v1198_v3 }
  0x48   :  { %1065 = vmatpush3.bf16.msra.mxu1 %v1064_v17  ;;  %1137 = vmatpush3.bf16.msra.mxu0 %v1136_v18 }
  0x49   :  { %1066 = vmatprep.subr.bf16.mxu1 %v1198_v3  ;;  %1138 = vmatprep.subr.bf16.mxu0 %v1198_v3 }
  0x4c   :  { %1068 = vmatpush3.bf16.msra.mxu1 %v1067_v26  ;;  %1140 = vmatpush3.bf16.msra.mxu0 %v1139_v28 }
  0x4d   :  { %1069 = vmatprep.subr.bf16.mxu1 %v1198_v3  ;;  %1141 = vmatprep.subr.bf16.mxu0 %v1198_v3 }
  0x50   :  { %1071 = vmatpush3.bf16.msra.mxu1 %v1070_v30  ;;  %1143 = vmatpush3.bf16.msra.mxu0 %v1142_v36 }
  0x51   :  { %1072 = vmatprep.subr.bf16.mxu1 %v1198_v3  ;;  %1144 = vmatprep.subr.bf16.mxu0 %v1198_v3 }
  0x53   :  { %882 = vmatmul.mubr.f32.vlgmr.msra.gmra.mrb[0].mxu1 %v1321_v33  ;;  %987 = vmatmul.mubr.f32.vlgmr.msra.gmra.mrb[0].mxu0 %v1321_v33 }
  0x54   :  { %1074 = vmatpush3.bf16.msra.mxu1 %v1073_v49  ;;  %1146 = vmatpush3.bf16.msra.mxu0 %v1257_v12  ;;  %v1082_v12 = vpack.c.bf16 %v1401_v61, %v1398_v60 }
  0x55   :  { %1075 = vmatprep.subr.bf16.mxu1 %v1198_v3  ;;  %1147 = vmatprep.subr.bf16.mxu0 %v1198_v3 }
  0x56   :  { %916 = vmatprep.mubr.msk.f32.mxu1 %vm1199_vm0, %v1200_v11  ;;  %1021 = vmatprep.mubr.msk.f32.mxu0 %vm1199_vm0, %v1200_v11  ;;  %v1085_v11 = vpack.c.bf16 %v1422_v8, %v1419_v7 }
  0x58   :  { %1077 = vmatpush3.bf16.msra.mxu1 %v1076_v54  ;;  %1149 = vmatpush3.bf16.msra.mxu0 %v1261_v13  ;;  %v1088_v13 = vpack.c.bf16 %v1440_v23, %v1435_v22 }
  0x59   :  { %1078 = vmatprep.subr.bf16.mxu1 %v1198_v3  ;;  %1150 = vmatprep.subr.bf16.mxu0 %v1198_v3 }
  0x5c   :  { %1080 = vmatpush3.bf16.msra.mxu1 %v1079_v32  ;;  %1152 = vmatpush3.bf16.msra.mxu0 %v1285_v20  ;;  %v1091_v20 = vpack.c.bf16 %v1456_v37, %v1451_v31 }
  0x5d   :  { %1081 = vmatprep.subr.bf16.mxu1 %v1198_v3  ;;  %1153 = vmatprep.subr.bf16.mxu0 %v1198_v3 }
  0x60   :  { %1083 = vmatpush3.bf16.msra.mxu1 %v1082_v12  ;;  %1155 = vmatpush3.bf16.msra.mxu0 %v1303_v27  ;;  %v1094_v27 = vpack.c.bf16 %v1476_v59, %v1471_v45 }
  0x61   :  { %1084 = vmatprep.subr.bf16.mxu1 %v1198_v3  ;;  %1156 = vmatprep.subr.bf16.mxu0 %v1198_v3 }
  0x64   :  { %1086 = vmatpush3.bf16.msra.mxu1 %v1085_v11  ;;  %1158 = vmatpush3.bf16.msra.mxu0 %v1327_v35 }
  0x65   :  { %1087 = vmatprep.subr.bf16.mxu1 %v1198_v3  ;;  %1159 = vmatprep.subr.bf16.mxu0 %v1198_v3 }
  0x68   :  { %1089 = vmatpush3.bf16.msra.mxu1 %v1088_v13  ;;  %1161 = vmatpush3.bf16.msra.mxu0 %v1357_v44 }
  0x69   :  { %1090 = vmatprep.subr.bf16.mxu1 %v1198_v3  ;;  %1162 = vmatprep.subr.bf16.mxu0 %v1198_v3 }
  0x6c   :  { %1092 = vmatpush3.bf16.msra.mxu1 %v1091_v20  ;;  %1164 = vmatpush3.bf16.msra.mxu0 %v1390_v56 }
  0x6d   :  { %1093 = vmatprep.subr.bf16.mxu1 %v1198_v3  ;;  %1165 = vmatprep.subr.bf16.mxu0 %v1198_v3  ;;  %v699_v3 = vstv %s698_s1 }
  0x70   :  { %1095 = vmatpush3.bf16.msra.mxu1 %v1094_v27  ;;  %1167 = vmatpush3.bf16.msra.mxu0 %v1413_v2  ;;  %v702_v2 = vstv %s711_s26 }
  0x73   :  { %917 = vmatmul.mubr.f32.vlgmr.msra.gmra.mrb[0].mxu1 %v1349_v43  ;;  %1022 = vmatmul.mubr.f32.vlgmr.msra.gmra.mrb[0].mxu0 %v1321_v33 }
 0x146   :  { %v392_v34 = vpop.f32.mrb[0].mxu1  ;;  %v687_v35 = vpop.f32.mrb[0].mxu0 }
 0x147   :  { %v1168_v40 = vadd.f32 %v687_v35, %v392_v34  ;;  %v918_v41 = vpop.f32.mrb[1].mxu1  ;;  %v1023_v44 = vpop.f32.mrb[1].mxu0 }
 0x149   :  { %1181 = vrsqrt.f32 %v1168_v40  ;;  %vm693_vm1 = vcmp.eq.f32.partialorder %v1168_v40, inf  ;;  %v696_v56 = vand.u32 2147483648, %v1168_v40  ;;  %vm695_vm2 = vcmp.eq.f32.partialorder %v1168_v40, 0.0 }
 0x153   :  { %v1182_v50 = vpop.eup %1181 }
 0x154   :  { %v692_v51 = vmul.f32 %v1182_v50, %v1168_v40 }
 0x156   :  { %v694_v60 = vsel %vm693_vm1, %v1168_v40, %v692_v51 }
 0x157   :  { %v697_v61 = vsel %vm695_vm2, %v696_v56, %v694_v60 }
 0x158   :  { %v700_v43 = vmul.f32 %v699_v3, %v697_v61 }
 0x15a   :  { %v703_v33 = vadd.f32 %v702_v2, %v700_v43 }
 0x15c   :  { %705 = vst.msk [vmem:[%s1553_s4] sm:$0x3] %vm704_vm3, %v703_v33 }
 0x15d   :  { %710 = vsyncpa [#allocation3], 1 }

</bundles_post_ra>
